<compile_context>
chip_gen: v5e
topology: v5e:2x2
jax: 0.10.0
libtpu: 0.0.40
codegen_flags: <defaults>
</compile_context>

<pallas_src>
import functools

import jax
import jax.numpy as jnp
from jax import lax
from jax.experimental import pallas as pl
from jax.experimental.pallas import tpu as pltpu


def _ffn_kernel(x_ref, w1_ref, w3_ref, w2_ref, o_ref, acc_ref):
    # x_ref:  (tm, dim)   activation rows (compute dtype)
    # w1_ref: (dim, th)   W1^T tile
    # w3_ref: (dim, th)   W3^T tile
    # w2_ref: (th, dim)   W2^T tile
    # o_ref:  (tm, dim)   output rows (x dtype)
    # acc_ref:(tm, dim)   f32 accumulator over hidden tiles
    j = pl.program_id(1)

    @pl.when(j == 0)
    def _():
        acc_ref[...] = jnp.zeros_like(acc_ref)

    x = x_ref[...]
    # Two gate matmuls on the MXU with f32 accumulation.
    h1 = jnp.dot(x, w1_ref[...], preferred_element_type=jnp.float32)
    h3 = jnp.dot(x, w3_ref[...], preferred_element_type=jnp.float32)
    # SwiGLU gate in f32 (sigmoid rides the EUP slot).
    g = (h1 * jax.nn.sigmoid(h1)) * h3
    # Down-projection, accumulated over hidden tiles.
    acc_ref[...] += jnp.dot(g.astype(w2_ref.dtype), w2_ref[...],
                            preferred_element_type=jnp.float32)

    @pl.when(j == pl.num_programs(1) - 1)
    def _():
        o_ref[...] = acc_ref[...].astype(o_ref.dtype)


def feed_forward(x, w1, w2, w3, *, tm=512, th=512):
    """SwiGLU feed-forward.

    x:  (B, S, dim)
    w1: (hidden, dim)   PyTorch nn.Linear layout (out_features, in_features)
    w2: (dim, hidden)
    w3: (hidden, dim)
    returns (B, S, dim), dtype of x.
    """
    B, S, dim = x.shape
    H = w1.shape[0]
    assert w1.shape == (H, dim) and w3.shape == (H, dim) and w2.shape == (dim, H)
    M = B * S

    x2 = x.reshape(M, dim)

    # Pre-transpose / pre-cast weights once in the wrapper.
    cdt = x.dtype
    w1t = w1.T.astype(cdt)   # (dim, H)
    w3t = w3.T.astype(cdt)   # (dim, H)
    w2t = w2.T.astype(cdt)   # (H, dim)

    # Row tile: sublane (8) aligned; partial last block handled by Pallas.
    tm = max(8, min(tm, M))
    tm = ((tm + 7) // 8) * 8
    grid_m = pl.cdiv(M, tm)

    # Hidden tile: lane (128) aligned, else fall back to the full hidden extent.
    th = min(th, H)
    if th % 128 != 0:
        th = H
    grid_h = pl.cdiv(H, th)

    # Raise the scoped VMEM limit only if the chosen tiles need it (cap 64 MiB).
    itm = jnp.dtype(cdt).itemsize
    need = (2 * (tm * dim + 2 * dim * th + th * dim) * itm   # double-buffered inputs
            + 2 * tm * dim * itm                             # double-buffered output
            + tm * dim * 4)                                  # f32 accumulator
    cp_kwargs = dict(dimension_semantics=("parallel", "arbitrary"))
    if need > 16 * 1024 * 1024:
        cp_kwargs["vmem_limit_bytes"] = int(min(need * 5 // 4, 64 * 1024 * 1024))

    out = pl.pallas_call(
        _ffn_kernel,
        out_shape=jax.ShapeDtypeStruct((M, dim), x.dtype),
        grid_spec=pltpu.PrefetchScalarGridSpec(
            num_scalar_prefetch=0,
            grid=(grid_m, grid_h),
            in_specs=[
                pl.BlockSpec((tm, dim), lambda i, j: (i, 0)),
                pl.BlockSpec((dim, th), lambda i, j: (0, j)),
                pl.BlockSpec((dim, th), lambda i, j: (0, j)),
                pl.BlockSpec((th, dim), lambda i, j: (j, 0)),
            ],
            out_specs=pl.BlockSpec((tm, dim), lambda i, j: (i, 0)),
            scratch_shapes=[pltpu.VMEM((tm, dim), jnp.float32)],
        ),
        compiler_params=pltpu.CompilerParams(**cp_kwargs),
    )(x2, w1t, w3t, w2t)

    return out.reshape(B, S, dim)


def _reference(x, w1, w2, w3):
    xf = x.astype(jnp.float32)
    h1 = xf @ w1.T.astype(jnp.float32)
    h3 = xf @ w3.T.astype(jnp.float32)
    g = (h1 * jax.nn.sigmoid(h1)) * h3
    return (g @ w2.T.astype(jnp.float32)).astype(x.dtype)


if __name__ == "__main__":
    # FeedForward(dim=32, hidden_dim=48, multiple_of=8, ffn_dim_multiplier=None)
    #   hidden = multiple_of * ceil(int(2*48/3) / multiple_of) = 32
    B, S, DIM = 2, 8, 32
    hidden_dim, multiple_of, ffn_dim_multiplier = 48, 8, None
    hd = int(2 * hidden_dim / 3)
    if ffn_dim_multiplier is not None:
        hd = int(ffn_dim_multiplier * hd)
    H = multiple_of * ((hd + multiple_of - 1) // multiple_of)

    key = jax.random.PRNGKey(0)
    k1, k2, k3, k4 = jax.random.split(key, 4)
    x = jax.random.normal(k1, (B, S, DIM), dtype=jnp.float32)
    w1 = 0.1 * jax.random.normal(k2, (H, DIM), dtype=jnp.float32)
    w2 = 0.1 * jax.random.normal(k3, (DIM, H), dtype=jnp.float32)
    w3 = 0.1 * jax.random.normal(k4, (H, DIM), dtype=jnp.float32)

    out = feed_forward(x, w1, w2, w3)
    out = jax.block_until_ready(out)

    ref = _reference(x, w1, w2, w3)
    assert out.shape == (B, S, DIM) and out.dtype == x.dtype
    assert jnp.allclose(out, ref, atol=1e-5, rtol=1e-5), \
        float(jnp.max(jnp.abs(out - ref)))

    print("KERNEL_OK")
</pallas_src>

<mosaic_0001>
module attributes {stable_mosaic.version = 11 : i64} {
  func.func @_ffn_kernel(%arg0: i32, %arg1: i32, %arg2: memref<16x32xf32, #tpu.memory_space<vmem>>, %arg3: memref<32x32xf32, #tpu.memory_space<vmem>>, %arg4: memref<32x32xf32, #tpu.memory_space<vmem>>, %arg5: memref<32x32xf32, #tpu.memory_space<vmem>>, %arg6: memref<16x32xf32, #tpu.memory_space<vmem>>, %arg7: memref<16x32xf32, #tpu.memory_space<vmem>>) attributes {dimension_semantics = [#tpu.dimension_semantics<parallel>, #tpu.dimension_semantics<arbitrary>], iteration_bounds = array<i64: 1, 1>, scalar_prefetch = 0 : i64, scratch_operands = 1 : i64, tpu.core_type = #tpu.core_type<tc>, window_params = [{transform_indices = @transform_0, window_bounds = array<i64: 16, 32>}, {transform_indices = @transform_1, window_bounds = array<i64: 32, 32>}, {transform_indices = @transform_2, window_bounds = array<i64: 32, 32>}, {transform_indices = @transform_3, window_bounds = array<i64: 32, 32>}, {transform_indices = @transform_4, window_bounds = array<i64: 16, 32>}]} {
    %c0_i32 = arith.constant 0 : i32
    %0 = arith.cmpi eq, %arg1, %c0_i32 : i32
    %1 = arith.extui %0 : i1 to i32
    %c0_i32_0 = arith.constant 0 : i32
    %2 = arith.cmpi ne, %1, %c0_i32_0 : i32
    scf.if %2 {
      %cst_17 = arith.constant 0.000000e+00 : f32
      %23 = vector.broadcast %cst_17 : f32 to vector<16x32xf32>
      %c0_18 = arith.constant 0 : index
      %c0_19 = arith.constant 0 : index
      %24 = vector.load %arg7[%c0_18, %c0_19] : memref<16x32xf32, #tpu.memory_space<vmem>>, vector<16x32xf32>
      tpu.vector_store %arg7[%c0_18, %c0_19], %23 {strides = array<i32>} : memref<16x32xf32, #tpu.memory_space<vmem>>, vector<16x32xf32>,
    } else {
    }
    %c0 = arith.constant 0 : index
    %c0_1 = arith.constant 0 : index
    %3 = vector.load %arg2[%c0, %c0_1] : memref<16x32xf32, #tpu.memory_space<vmem>>, vector<16x32xf32>
    %c0_2 = arith.constant 0 : index
    %c0_3 = arith.constant 0 : index
    %4 = vector.load %arg3[%c0_2, %c0_3] : memref<32x32xf32, #tpu.memory_space<vmem>>, vector<32x32xf32>
    %cst = arith.constant dense<0.000000e+00> : vector<16x32xf32>
    %5 = tpu.matmul %3, %4, %cst {dimension_numbers = #tpu.dot_dimension_numbers<[1], [0], [0], [1], [0, 0, 1, 1], [], []>} : vector<16x32xf32>, vector<32x32xf32>, vector<16x32xf32> -> vector<16x32xf32>
    %c0_4 = arith.constant 0 : index
    %c0_5 = arith.constant 0 : index
    %6 = vector.load %arg4[%c0_4, %c0_5] : memref<32x32xf32, #tpu.memory_space<vmem>>, vector<32x32xf32>
    %cst_6 = arith.constant dense<0.000000e+00> : vector<16x32xf32>
    %7 = tpu.matmul %3, %6, %cst_6 {dimension_numbers = #tpu.dot_dimension_numbers<[1], [0], [0], [1], [0, 0, 1, 1], [], []>} : vector<16x32xf32>, vector<32x32xf32>, vector<16x32xf32> -> vector<16x32xf32>
    %8 = arith.negf %5 : vector<16x32xf32>
    %9 = math.exp %8 : vector<16x32xf32>
    %cst_7 = arith.constant 1.000000e+00 : f32
    %10 = vector.broadcast %cst_7 : f32 to vector<16x32xf32>
    %11 = arith.addf %10, %9 : vector<16x32xf32>
    %12 = arith.divf %10, %11 : vector<16x32xf32>
    %13 = arith.mulf %5, %12 : vector<16x32xf32>
    %14 = arith.mulf %13, %7 : vector<16x32xf32>
    %c0_8 = arith.constant 0 : index
    %c0_9 = arith.constant 0 : index
    %15 = vector.load %arg7[%c0_8, %c0_9] : memref<16x32xf32, #tpu.memory_space<vmem>>, vector<16x32xf32>
    %c0_10 = arith.constant 0 : index
    %c0_11 = arith.constant 0 : index
    %16 = vector.load %arg5[%c0_10, %c0_11] : memref<32x32xf32, #tpu.memory_space<vmem>>, vector<32x32xf32>
    %cst_12 = arith.constant dense<0.000000e+00> : vector<16x32xf32>
    %17 = tpu.matmul %14, %16, %cst_12 {dimension_numbers = #tpu.dot_dimension_numbers<[1], [0], [0], [1], [0, 0, 1, 1], [], []>} : vector<16x32xf32>, vector<32x32xf32>, vector<16x32xf32> -> vector<16x32xf32>
    %18 = arith.addf %15, %17 : vector<16x32xf32>
    %c0_13 = arith.constant 0 : index
    %c0_14 = arith.constant 0 : index
    %19 = vector.load %arg7[%c0_13, %c0_14] : memref<16x32xf32, #tpu.memory_space<vmem>>, vector<16x32xf32>
    tpu.vector_store %arg7[%c0_13, %c0_14], %18 {strides = array<i32>} : memref<16x32xf32, #tpu.memory_space<vmem>>, vector<16x32xf32>,
    %c0_i32_15 = arith.constant 0 : i32
    %20 = arith.cmpi eq, %arg1, %c0_i32_15 : i32
    %21 = arith.extui %20 : i1 to i32
    %c0_i32_16 = arith.constant 0 : i32
    %22 = arith.cmpi ne, %21, %c0_i32_16 : i32
    scf.if %22 {
      %c0_17 = arith.constant 0 : index
      %c0_18 = arith.constant 0 : index
      %23 = vector.load %arg7[%c0_17, %c0_18] : memref<16x32xf32, #tpu.memory_space<vmem>>, vector<16x32xf32>
      %c0_19 = arith.constant 0 : index
      %c0_20 = arith.constant 0 : index
      %24 = vector.load %arg6[%c0_19, %c0_20] : memref<16x32xf32, #tpu.memory_space<vmem>>, vector<16x32xf32>
      tpu.vector_store %arg6[%c0_19, %c0_20], %23 {strides = array<i32>} : memref<16x32xf32, #tpu.memory_space<vmem>>, vector<16x32xf32>,
    } else {
    }
    return
  }
  func.func @transform_0(%arg0: i32, %arg1: i32) -> (i32, i32) {
    %c0_i32 = arith.constant 0 : i32
    %c0_i32_0 = arith.constant 0 : i32
    return %arg0, %c0_i32 : i32, i32
  }
  func.func @transform_1(%arg0: i32, %arg1: i32) -> (i32, i32) {
    %c0_i32 = arith.constant 0 : i32
    %c0_i32_0 = arith.constant 0 : i32
    return %c0_i32, %arg1 : i32, i32
  }
  func.func @transform_2(%arg0: i32, %arg1: i32) -> (i32, i32) {
    %c0_i32 = arith.constant 0 : i32
    %c0_i32_0 = arith.constant 0 : i32
    return %c0_i32, %arg1 : i32, i32
  }
  func.func @transform_3(%arg0: i32, %arg1: i32) -> (i32, i32) {
    %c0_i32 = arith.constant 0 : i32
    %c0_i32_0 = arith.constant 0 : i32
    return %arg1, %c0_i32 : i32, i32
  }
  func.func @transform_4(%arg0: i32, %arg1: i32) -> (i32, i32) {
    %c0_i32 = arith.constant 0 : i32
    %c0_i32_0 = arith.constant 0 : i32
    return %arg0, %c0_i32 : i32, i32
  }
}

</mosaic_0001>

<bundles_post_ra>
// kernel: tpu_custom_call.1
= control target key start
LH: loop header
LB: loop body
LE: loop exit
PB: predicated region body
PF: predicated region fallthrough
CT: control target
= control target key end

     0   :  { %9 = vsyncpa [#allocation4], 0  ;;  %s491_s0 = inlined_call_operand.hbm [shape: f32[16,32], index: 0, kind: input, shape index: {}]   ;;  %s492_s1 = inlined_call_operand.hbm [shape: f32[32,32], index: 1, kind: input, shape index: {}]   ;;  %s493_s2 = inlined_call_operand.hbm [shape: f32[32,32], index: 2, kind: input, shape index: {}]   ;;  %s494_s3 = inlined_call_operand.hbm [shape: f32[32,32], index: 3, kind: input, shape index: {}]   ;;  %s495_s4 = inlined_call_operand.hbm [shape: f32[16,32], index: 4, kind: output, shape index: {}]  }
   0x1   :  { %10 = vsyncpa [#allocation7], 0 }
   0x2   :  { %11 = vsyncpa [#allocation10], 0 }
   0x3   :  { %12 = vsyncpa [#allocation5], 0  ;;  %s30_s17 = sshll.u32 %s492_s1, 4  ;;  %s416_s18 = smov [#allocation6]   ;;  %s31_s17 = int_to_ptr.hbm [resolvable:$true] %s30_s17 }
   0x4   :  { %s32_s19 = sshll.u32 %s416_s18, 4  ;;  %s17_s22 = sshll.u32 %s491_s0, 4  ;;  %s33_s19 = int_to_ptr.vmem [resolvable:$true] %s32_s19  ;;  %s18_s22 = int_to_ptr.hbm [resolvable:$true] %s17_s22 }
   0x5   :  { %s417_s23 = smov 128   ;;  %s418_s24 = smov 8  }
   0x6   :  { %38 = dma.hbm_to_vmem [thread:$0]  %s31_s17, 512, %s33_s19, [#allocation7], %s417_s23, %s417_s23, %s418_s24  }
   0x7   :  { %s419_s25 = smov [#allocation3]   ;;  %s43_s1 = sshll.u32 %s493_s2, 4  ;;  %s44_s1 = int_to_ptr.hbm [resolvable:$true] %s43_s1 }
   0x8   :  { %s19_s26 = sshll.u32 %s419_s25, 4  ;;  %s56_s30 = sshll.u32 %s494_s3, 4  ;;  %s20_s26 = int_to_ptr.vmem [resolvable:$true] %s19_s26  ;;  %s57_s30 = int_to_ptr.hbm [resolvable:$true] %s56_s30 }
   0x9   :  { %25 = dma.hbm_to_vmem [thread:$0]  %s18_s22, 256, %s20_s26, [#allocation4], %s417_s23, %s417_s23, %s418_s24  }
   0xa   :  { %s420_s5 = smov [#allocation8]   ;;  %s421_s7 = smov [#allocation9]  }
   0xb   :  { %s45_s6 = sshll.u32 %s420_s5, 4  ;;  %s58_s2 = sshll.u32 %s421_s7, 4  ;;  %s46_s6 = int_to_ptr.vmem [resolvable:$true] %s45_s6  ;;  %s59_s2 = int_to_ptr.vmem [resolvable:$true] %s58_s2 }
   0xc   :  { %51 = dma.hbm_to_vmem [thread:$0]  %s44_s1, 512, %s46_s6, [#allocation7], %s417_s23, %s417_s23, %s418_s24  }
   0xd   :  { %64 = dma.hbm_to_vmem [thread:$0]  %s57_s30, 512, %s59_s2, [#allocation10], %s417_s23, %s417_s23, %s418_s24  }
   0xe   :  { %408 = dma.done.wait [#allocation4], 256  }
   0xf   :  { %409 = vsyncadd [#allocation4], 4294967040 }
  0x10   :  { %410 = dma.done.wait [#allocation7], 1024  }
  0x11   :  { %411 = vsyncadd [#allocation7], 4294966272 }
  0x12   :  { %412 = dma.done.wait [#allocation10], 512  }
  0x13   :  { %413 = vsyncadd [#allocation10], 4294966784  ;;  %v93_v0 = vld [vmem:[#allocation6 + $0x18] sm:$0xff]  ;;  %v92_v1 = vld [vmem:[#allocation6 + $0x10] sm:$0xff]  ;;  %vm85_vm0 = vcmask 261120   ;;  %v422_v20 = vmov 0.0  }
  0x14   :  { %113 = vmatpush.msra.mxu0 %v93_v0  ;;  %268 = vmatpush.msra.mxu3 %v93_v0  ;;  %v91_v2 = vld [vmem:[#allocation6 + $0x8] sm:$0xff]  ;;  %v127_v3 = vld [vmem:[#allocation8 + $0x18] sm:$0xff]  ;;  %v126_v4 = vld [vmem:[#allocation8 + $0x10] sm:$0xff]  ;;  %86 = vst.msk [vmem:[#allocation2] sm:$0xff] %vm85_vm0, %v422_v20  ;;  %s423_s3 = smov [#allocation11]   ;;  %s245_s11 = sshll.u32 %s495_s4, 4  ;;  %s246_s11 = int_to_ptr.hbm [resolvable:$true] %s245_s11 }
  0x15   :  { %v90_v5 = vld [vmem:[#allocation6] sm:$0xff]  ;;  %140 = vmatpush.msra.mxu1 %v127_v3  ;;  %v88_v6 = vld [vmem:[#allocation3] sm:$0xff]  ;;  %v89_v7 = vld [vmem:[#allocation3 + $0x8] sm:$0xff]  ;;  %87 = vst.msk [vmem:[#allocation2 + $0x8] sm:$0xff] %vm85_vm0, %v422_v20  ;;  %s243_s8 = sshll.u32 %s423_s3, 4  ;;  %s244_s8 = int_to_ptr.vmem [resolvable:$true] %s243_s8 }
  0x16   :  { %114 = vmatpush.msra.mxu0 %v92_v1  ;;  %269 = vmatpush.msra.mxu3 %v92_v1  ;;  %v125_v8 = vld [vmem:[#allocation8 + $0x8] sm:$0xff]  ;;  %v124_v9 = vld [vmem:[#allocation8] sm:$0xff]  ;;  %v198_v10 = vld [vmem:[#allocation9 + $0x18] sm:$0xff] }
  0x17   :  { %141 = vmatpush.msra.mxu1 %v126_v4  ;;  %217 = vmatpush.msra.mxu2 %v198_v10  ;;  %v197_v11 = vld [vmem:[#allocation9 + $0x10] sm:$0xff]  ;;  %v196_v12 = vld [vmem:[#allocation9 + $0x8] sm:$0xff]  ;;  %v195_v13 = vld [vmem:[#allocation9] sm:$0xff] }
  0x18   :  { %115 = vmatpush.msra.mxu0 %v91_v2  ;;  %270 = vmatpush.msra.mxu3 %v91_v2 }
  0x19   :  { %142 = vmatpush.msra.mxu1 %v125_v8  ;;  %218 = vmatpush.msra.mxu2 %v197_v11 }
  0x1a   :  { %116 = vmatpush.msra.mxu0 %v90_v5  ;;  %271 = vmatpush.msra.mxu3 %v90_v5 }
  0x1b   :  { %260 = vmatmul.msk.f32.vlgmr.msra.gmra.mxu0 %vm85_vm0, %v88_v6  ;;  %261 = vmatmul.msk.f32.vlgmr.msra.gmra.mxu3 %vm85_vm0, %v89_v7  ;;  %v193_v49 = vld [vmem:[#allocation2] sm:$0xff] }
  0x1c   :  { %143 = vmatpush.msra.mxu1 %v124_v9  ;;  %219 = vmatpush.msra.mxu2 %v196_v12  ;;  %v194_v52 = vld [vmem:[#allocation2 + $0x8] sm:$0xff] }
  0x1d   :  { %262 = vmatmul.msk.f32.vlgmr.msra.gmra.mxu1 %vm85_vm0, %v88_v6 }
  0x1e   :  { %220 = vmatpush.msra.mxu2 %v195_v13 }
  0x25   :  { %263 = vmatmul.msk.f32.gmra.mxu1 %vm85_vm0, %v89_v7 }
  0x98   :  { %v118_v14 = vpop.f32.mrf.mxu0 }
  0x99   :  { %v264_v15 = vmul.f32 -1.442695, %v118_v14 }
  0x9a   :  { %v145_v33 = vpop.f32.mrf.mxu1 }
  0x9b   :  { %280 = vpow2.f32 %v264_v15 }
  0x9e   :  { %v121_v16 = vpop.f32.mrf.mxu3 }
  0x9f   :  { %v265_v17 = vmul.f32 -1.442695, %v121_v16 }
  0xa1   :  { %v281_v18 = vpop.eup %280  ;;  %282 = vpow2.f32 %v265_v17 }
  0xa2   :  { %v157_v19 = vadd.f32 1.0, %v281_v18  ;;  %v148_v47 = vpop.f32.mrf.mxu1 }
  0xa4   :  { %284 = vrcp.f32 %v157_v19  ;;  %v170_v26 = vand.u32 2147483648, %v157_v19  ;;  %v168_v28 = vand.u32 2147483647, %v157_v19  ;;  %vm164_vm2 = vweird.f32 %v157_v19 }
  0xa6   :  { %v171_v32 = vor.u32 1.1754944e-38, %v170_v26  ;;  %vm169_vm4 = vcmp.eq.f32.partialorder %v168_v28, 8.507059e+37 }
  0xa7   :  { %v283_v21 = vpop.eup %282 }
  0xa8   :  { %v158_v22 = vadd.f32 1.0, %v283_v21 }
  0xaa   :  { %v285_v23 = vpop.eup %284  ;;  %286 = vrcp.f32 %v158_v22  ;;  %v185_v37 = vand.u32 2147483648, %v158_v22  ;;  %v183_v40 = vand.u32 2147483647, %v158_v22  ;;  %vm179_vm6 = vweird.f32 %v158_v22 }
  0xab   :  { %v160_v24 = vmul.f32 %v285_v23, %v157_v19  ;;  %vm165_vm1 = vweird.f32 %v285_v23 }
  0xac   :  { %vm166_vm3 = vmor %vm164_vm2, %vm165_vm1  ;;  %v186_v43 = vor.u32 1.1754944e-38, %v185_v37  ;;  %vm184_vm8 = vcmp.eq.f32.partialorder %v183_v40, 8.507059e+37 }
  0xad   :  { %v161_v25 = vsub.f32 1.0, %v160_v24 }
  0xaf   :  { %v162_v27 = vmul.f32 %v285_v23, %v161_v25 }
  0xb0   :  { %v287_v29 = vpop.eup %286 }
  0xb1   :  { %v163_v30 = vadd.f32 %v285_v23, %v162_v27  ;;  %v175_v31 = vmul.f32 %v287_v29, %v158_v22  ;;  %vm180_vm5 = vweird.f32 %v287_v29 }
  0xb2   :  { %vm181_vm7 = vmor %vm179_vm6, %vm180_vm5 }
  0xb3   :  { %v167_v34 = vsel %vm166_vm3, %v285_v23, %v163_v30  ;;  %v176_v35 = vsub.f32 1.0, %v175_v31 }
  0xb4   :  { %v172_v36 = vsel %vm169_vm4, %v171_v32, %v167_v34 }
  0xb5   :  { %v189_v38 = vmul.f32 %v172_v36, %v118_v14  ;;  %v177_v39 = vmul.f32 %v287_v29, %v176_v35 }
  0xb7   :  { %v178_v41 = vadd.f32 %v287_v29, %v177_v39  ;;  %v191_v42 = vmul.f32 %v189_v38, %v145_v33 }
  0xb9   :  { %v182_v44 = vsel %vm181_vm7, %v287_v29, %v178_v41  ;;  %266 = vmatmul.msk.f32.vlgmr.msra.gmra.mxu2 %vm85_vm0, %v191_v42 }
  0xba   :  { %v187_v45 = vsel %vm184_vm8, %v186_v43, %v182_v44 }
  0xbb   :  { %v190_v46 = vmul.f32 %v187_v45, %v121_v16 }
  0xbd   :  { %v192_v48 = vmul.f32 %v190_v46, %v148_v47 }
  0xc1   :  { %267 = vmatmul.msk.f32.gmra.mxu2 %vm85_vm0, %v192_v48 }
 0x13c   :  { %v222_v50 = vpop.f32.mrf.mxu2 }
 0x13d   :  { %v228_v51 = vadd.f32 %v222_v50, %v193_v49 }
 0x13f   :  { %230 = vst.msk [vmem:[#allocation2] sm:$0xff] %vm85_vm0, %v228_v51 }
 0x144   :  { %v225_v53 = vpop.f32.mrf.mxu2 }
 0x145   :  { %v229_v54 = vadd.f32 %v225_v53, %v194_v52 }
 0x146   :  { %v235_v55 = vld [vmem:[#allocation2] sm:$0xff] }
 0x147   :  { %231 = vst.msk [vmem:[#allocation2 + $0x8] sm:$0xff] %vm85_vm0, %v229_v54 }
 0x148   :  { %237 = vst.msk [vmem:[#allocation11] sm:$0xff] %vm85_vm0, %v235_v55 }
 0x14e   :  { %v236_v56 = vld [vmem:[#allocation2 + $0x8] sm:$0xff] }
 0x14f   :  { %238 = vst.msk [vmem:[#allocation11 + $0x8] sm:$0xff] %vm85_vm0, %v236_v56 }
 0x150   :  { %251 = dma.vmem_to_hbm [thread:$0]  %s244_s8, 256, %s246_s11, [#allocation5], %s417_s23, %s417_s23, %s418_s24  }
 0x151   :  { %414 = dma.done.wait [#allocation5], 256  }
 0x152   :  { %415 = vsyncadd [#allocation5], 4294967040 }
 0x153   :  { %256 = vsyncpa [#allocation4], 1 }
 0x154   :  { %257 = vsyncpa [#allocation7], 1 }
 0x155   :  { %258 = vsyncpa [#allocation10], 1 }
 0x156   :  { %259 = vsyncpa [#allocation5], 1 }

</bundles_post_ra>
